<compile_context>
chip_gen: v6e
topology: v6e:2x2x1
jax: 0.10.0
libtpu: 0.0.40
codegen_flags: <defaults>
</compile_context>

<pallas_src>
import jax
import jax.numpy as jnp
from jax.experimental import pallas as pl
from jax.experimental.pallas import tpu as pltpu


def _round_up(x, m):
    return (x + m - 1) // m * m


def _choose_tb(batch):
    """Batch tile: multiple of 8 sublanes; large enough to amortize the
    ~0.35us per-grid-step overhead, but capped so mid-size batches still get
    >= 2 grid steps (the "parallel" axis shards across v7x's 2 TensorCores)."""
    b8 = _round_up(max(batch, 1), 8)
    if b8 <= 16:
        return b8
    half = _round_up(pl.cdiv(b8, 2), 8)
    return min(2048, half)


def nfm_kernel(emb_ref, vb_ref, expand_ref, sum_ref, w1_ref, b1_ref, wp_ref,
               gb_ref, out_ref):
    # emb_ref:    (TB, F*K) bf16  gathered embeddings, lane-dense
    # vb_ref:     (2, TB, F) f32  [0]=feature values, [1]=gathered feature biases
    # expand_ref: (F, F*K)  bf16  0/1 expansion matrix (vals -> repeated K times)
    # sum_ref:    (F*K, K)  bf16  0/1 block-summation matrix (sum over F)
    # w1_ref:     (K, L1)   bf16  MLP layer-1 weight (pre-transposed for x @ W)
    # b1_ref:     (1, L1)   f32   MLP layer-1 bias
    # wp_ref:     (1, L1)   f32   prediction weight row (Linear(L1,1,bias=False))
    # gb_ref:     (1,)      f32   global bias (SMEM)
    # out_ref:    (TB, 1)   f32
    TB = emb_ref.shape[0]
    emb = emb_ref[...]                                   # (TB, FK) bf16
    vals = vb_ref[0]                                     # (TB, F)  f32
    fbias = vb_ref[1]                                    # (TB, F)  f32

    # feature_values.unsqueeze(2) broadcast, done as a bf16 MXU matmul against
    # the constant 0/1 expansion matrix (keeps the elementwise chain 256 lanes
    # wide; no in-kernel repeat/relayout).
    vexp = jnp.dot(vals.astype(jnp.bfloat16), expand_ref[...],
                   preferred_element_type=jnp.float32).astype(jnp.bfloat16)

    # nonzero_embed = embeddings(features) * feature_values  (bf16 end-to-end).
    x = emb * vexp                                       # (TB, FK) bf16
    xx = x * x                                           # (TB, FK) bf16

    # FM bilinear interaction: 0.5 * ((sum_f x)^2 - sum_f x^2).
    # Both F-reductions are fused into one bf16 MXU pass by stacking [x ; x*x]
    # along the sublane (M) axis, so the (FK, K) RHS is latched only once.
    stacked = jnp.concatenate([x, xx], axis=0)           # (2*TB, FK) bf16
    red = jnp.dot(stacked, sum_ref[...],
                  preferred_element_type=jnp.float32)    # (2*TB, K) f32
    s, sq = red[:TB], red[TB:]
    fm = 0.5 * (s * s - sq)                              # (TB, K) f32

    # FM_layers: batch_norm=False; Dropout identity at inference.

    # deep_layers (MLP): Linear(K, L1) -> ReLU (Dropout identity at inference).
    h = jnp.dot(fm.astype(jnp.bfloat16), w1_ref[...],
                preferred_element_type=jnp.float32) + b1_ref[...]
    h = jnp.maximum(h, 0.0)                              # (TB, L1) f32

    # prediction Linear(L1 -> 1, bias=False): VPU multiply + lane reduction
    # instead of an N=1 MXU matmul.
    pred = jnp.sum(h * wp_ref[...], axis=-1, keepdims=True)      # (TB, 1)

    # feature_bias = (biases(features) * feature_values).sum(dim=1)  (exact f32)
    fb = jnp.sum(fbias * vals, axis=-1, keepdims=True)            # (TB, 1)

    # Output stays (TB, 1): 4 B/row (<0.5% of traffic); a lane-dense transpose
    # would cost XLU time shared with the MXU push slot for no measurable gain.
    out_ref[...] = pred + fb + gb_ref[0]


@jax.jit
def nfm_forward(features, feature_values, params):
    """features: (B, F) int32; feature_values: (B, F) float -> (B,) float32."""
    emb_table = params["embeddings"]             # (num_features, K) bf16
    bias_table = params["biases"]                # (num_features, 1) f32
    w1 = params["w1"].astype(jnp.bfloat16)       # (K, L1) bf16 MXU operand
    b1 = params["b1"]                            # (1, L1) f32
    wp_row = params["wp"].reshape(1, -1)         # (1, L1) f32
    gb = params["global_bias"].reshape(1)        # (1,)    f32

    B, F = features.shape
    K = emb_table.shape[1]
    L1 = w1.shape[1]
    FK = F * K

    # Embedding gathers stay in XLA (per-row in-kernel DMA at K=32 would be far
    # below useful DMA granularity).  bf16 table halves gather bytes.
    emb = jnp.take(emb_table, features, axis=0)             # (B, F, K) bf16
    emb2d = emb.reshape(B, FK)                               # contiguous: free
    fbias = jnp.take(bias_table[:, 0], features, axis=0)     # (B, F) f32
    vals = feature_values.astype(jnp.float32)
    valsbias = jnp.stack([vals, fbias], axis=0)              # (2, B, F): 1 stream

    TB = _choose_tb(B)
    B_pad = _round_up(B, TB)
    if B_pad != B:
        pad = B_pad - B
        emb2d = jnp.pad(emb2d, ((0, pad), (0, 0)))
        valsbias = jnp.pad(valsbias, ((0, 0), (0, pad), (0, 0)))

    # Constant 0/1 matrices; bf16 is exact for 0/1 and keeps the MXU single-pass.
    expand_mat = jnp.repeat(jnp.eye(F, dtype=jnp.bfloat16), K, axis=1)   # (F, FK)
    sum_mat = jnp.tile(jnp.eye(K, dtype=jnp.bfloat16), (F, 1))           # (FK, K)

    grid = (B_pad // TB,)

    flops = B_pad * (2 * F * FK + 2 * FK + 4 * FK * K + 4 * K
                     + 2 * K * L1 + 4 * L1 + 2 * F + 2)
    bytes_accessed = (emb2d.size * 2 + valsbias.size * 4 + B_pad * 4
                      + (expand_mat.size + sum_mat.size + w1.size) * 2
                      + (b1.size + wp_row.size + 1) * 4)

    # VMEM budget at TB=2048: emb double-buffer 2x1 MiB, packed vals/bias
    # 2x128 KiB, bf16 temporaries (vexp/x/xx/stacked) ~5 MiB, resident weights
    # and output negligible -> ~8 MiB, comfortably under v7x's 64 MiB physical
    # VMEM and the 32 MiB scoped limit below.
    out = pl.pallas_call(
        nfm_kernel,
        out_shape=jax.ShapeDtypeStruct((B_pad, 1), jnp.float32),
        grid=grid,
        in_specs=[
            pl.BlockSpec((TB, FK), lambda i: (i, 0)),       # emb: streamed per tile
            pl.BlockSpec((2, TB, F), lambda i: (0, i, 0)),  # packed vals+biases
            pl.BlockSpec((F, FK), lambda i: (0, 0)),        # expansion matrix (resident)
            pl.BlockSpec((FK, K), lambda i: (0, 0)),        # summation matrix (resident)
            pl.BlockSpec((K, L1), lambda i: (0, 0)),        # w1 (resident)
            pl.BlockSpec((1, L1), lambda i: (0, 0)),        # b1 (resident)
            pl.BlockSpec((1, L1), lambda i: (0, 0)),        # wp (resident)
            pl.BlockSpec(memory_space=pltpu.MemorySpace.SMEM),  # global bias
        ],
        out_specs=pl.BlockSpec((TB, 1), lambda i: (i, 0)),
        compiler_params=pltpu.CompilerParams(
            dimension_semantics=("parallel",),
            vmem_limit_bytes=32 * 1024 * 1024,
        ),
        cost_estimate=pl.CostEstimate(
            flops=int(flops), transcendentals=0,
            bytes_accessed=int(bytes_accessed)),
    )(emb2d, valsbias, expand_mat, sum_mat, w1, b1, wp_row, gb)

    return out[:B, 0]                          # fm.view(-1)


def nfm_reference(features, feature_values, params):
    """Pure-JAX f32 reference (same bf16 embedding storage) for sanity check."""
    emb = jnp.take(params["embeddings"].astype(jnp.float32), features, axis=0)
    vals = feature_values.astype(jnp.float32)[..., None]          # (B, F, 1)
    x = emb * vals
    s = x.sum(axis=1)
    sq = (x * x).sum(axis=1)
    fm = 0.5 * (s * s - sq)
    h = jnp.maximum(fm @ params["w1"] + params["b1"], 0.0)
    pred = h @ params["wp"]                                       # (B, 1)
    fb = (jnp.take(params["biases"], features, axis=0) * vals).sum(axis=1)
    return (pred + fb + params["global_bias"]).reshape(-1)


def init_params(key, num_features, num_factors, layers):
    """Deterministic init mimicking NFM.reset_parameters (no pre-trained FM)."""
    k_emb, k_w1, k_wp = jax.random.split(key, 3)
    L1 = layers[-1]

    def xavier_normal(k, shape):
        fan_in, fan_out = shape[0], shape[1]
        std = (2.0 / (fan_in + fan_out)) ** 0.5
        return std * jax.random.normal(k, shape, dtype=jnp.float32)

    params = {
        # nn.init.normal_(embeddings.weight, std=0.01); stored bf16 in HBM to
        # halve gather/DMA traffic (kernel keeps the bf16 datapath).
        "embeddings": (0.01 * jax.random.normal(
            k_emb, (num_features, num_factors),
            dtype=jnp.float32)).astype(jnp.bfloat16),
        # nn.init.constant_(biases.weight, 0.0)
        "biases": jnp.zeros((num_features, 1), dtype=jnp.float32),
        # global_bias = 0.0
        "global_bias": jnp.zeros((1,), dtype=jnp.float32),
        # MLP Linear(K, L1): xavier_normal_ weight (stored transposed for x @ W).
        # TODO(synk): PyTorch's default nn.Linear bias init is uniform, not 0;
        # reset_parameters only re-inits weights, so bias values are arbitrary.
        "w1": xavier_normal(k_w1, (num_factors, L1)),
        "b1": jnp.zeros((1, L1), dtype=jnp.float32),
        # prediction Linear(L1, 1, bias=False): xavier_normal_
        "wp": xavier_normal(k_wp, (L1, 1)),
    }
    return params


if __name__ == "__main__":
    NUM_FEATURES = 64      # size of embedding tables
    NUM_FACTORS = 32       # K
    LAYERS = [32]          # deep layer dims
    B, F = 8, 8            # batch, nonzero fields per sample

    key = jax.random.PRNGKey(0)
    k_params, k_feat, k_val = jax.random.split(key, 3)

    params = init_params(k_params, NUM_FEATURES, NUM_FACTORS, LAYERS)

    features = jax.random.randint(k_feat, (B, F), 0, NUM_FEATURES,
                                  dtype=jnp.int32)
    feature_values = jax.random.uniform(k_val, (B, F), dtype=jnp.float32)

    out = nfm_forward(features, feature_values, params)
    out = jax.block_until_ready(out)

    assert out.shape == (B,) and out.dtype == jnp.float32
    assert bool(jnp.all(jnp.isfinite(out)))

    # bf16 MXU operands add ~2^-9 relative rounding; outputs here are O(1e-4),
    # expected abs error a few 1e-6 -> generous 5e-5 tolerance.
    ref = nfm_reference(features, feature_values, params)
    max_err = float(jnp.max(jnp.abs(out - ref)))
    assert max_err < 5e-5, (max_err, out, ref)

    print("KERNEL_OK")
</pallas_src>

<mosaic_0001>
module attributes {stable_mosaic.version = 11 : i64} {
  func.func @nfm_kernel(%arg0: i32, %arg1: memref<8x256xbf16, #tpu.memory_space<vmem>>, %arg2: memref<2x8x8xf32, #tpu.memory_space<vmem>>, %arg3: memref<8x256xbf16, #tpu.memory_space<vmem>>, %arg4: memref<256x32xbf16, #tpu.memory_space<vmem>>, %arg5: memref<32x32xbf16, #tpu.memory_space<vmem>>, %arg6: memref<1x32xf32, #tpu.memory_space<vmem>>, %arg7: memref<1x32xf32, #tpu.memory_space<vmem>>, %arg8: memref<1xf32, #tpu.memory_space<smem>>, %arg9: memref<8x1xf32, #tpu.memory_space<vmem>>) attributes {dimension_semantics = [#tpu.dimension_semantics<parallel>], iteration_bounds = array<i64: 1>, scalar_prefetch = 0 : i64, scratch_operands = 0 : i64, tpu.core_type = #tpu.core_type<tc>, window_params = [{transform_indices = @transform_0, window_bounds = array<i64: 8, 256>}, {transform_indices = @transform_1, window_bounds = array<i64: 2, 8, 8>}, {pipeline_mode = #tpu.pipeline_mode<synchronous>, transform_indices = @transform_2, window_bounds = array<i64: 8, 256>}, {pipeline_mode = #tpu.pipeline_mode<synchronous>, transform_indices = @transform_3, window_bounds = array<i64: 256, 32>}, {pipeline_mode = #tpu.pipeline_mode<synchronous>, transform_indices = @transform_4, window_bounds = array<i64: 32, 32>}, {pipeline_mode = #tpu.pipeline_mode<synchronous>, transform_indices = @transform_5, window_bounds = array<i64: 1, 32>}, {pipeline_mode = #tpu.pipeline_mode<synchronous>, transform_indices = @transform_6, window_bounds = array<i64: 1, 32>}, {transform_indices = @transform_7, window_bounds = array<i64: 1>}, {transform_indices = @transform_8, window_bounds = array<i64: 8, 1>}]} {
    %c0 = arith.constant 0 : index
    %c0_0 = arith.constant 0 : index
    %0 = vector.load %arg1[%c0, %c0_0] : memref<8x256xbf16, #tpu.memory_space<vmem>>, vector<8x256xbf16>
    %c0_1 = arith.constant 0 : index
    %c0_2 = arith.constant 0 : index
    %c0_3 = arith.constant 0 : index
    %1 = vector.load %arg2[%c0_1, %c0_2, %c0_3] : memref<2x8x8xf32, #tpu.memory_space<vmem>>, vector<1x8x8xf32>
    %2 = vector.shape_cast %1 : vector<1x8x8xf32> to vector<8x8xf32>
    %c1 = arith.constant 1 : index
    %c0_4 = arith.constant 0 : index
    %c0_5 = arith.constant 0 : index
    %3 = vector.load %arg2[%c1, %c0_4, %c0_5] : memref<2x8x8xf32, #tpu.memory_space<vmem>>, vector<1x8x8xf32>
    %4 = vector.shape_cast %3 : vector<1x8x8xf32> to vector<8x8xf32>
    %5 = arith.truncf %2 : vector<8x8xf32> to vector<8x8xbf16>
    %c0_6 = arith.constant 0 : index
    %c0_7 = arith.constant 0 : index
    %6 = vector.load %arg3[%c0_6, %c0_7] : memref<8x256xbf16, #tpu.memory_space<vmem>>, vector<8x256xbf16>
    %cst = arith.constant dense<0.000000e+00> : vector<8x256xf32>
    %7 = tpu.matmul %5, %6, %cst {dimension_numbers = #tpu.dot_dimension_numbers<[1], [0], [0], [1], [0, 0, 1, 1], [], []>} : vector<8x8xbf16>, vector<8x256xbf16>, vector<8x256xf32> -> vector<8x256xf32>
    %8 = arith.truncf %7 : vector<8x256xf32> to vector<8x256xbf16>
    %9 = arith.mulf %0, %8 : vector<8x256xbf16>
    %10 = arith.mulf %9, %9 : vector<8x256xbf16>
    %11 = tpu.concatenate %9, %10 in 0 : vector<8x256xbf16>, vector<8x256xbf16> -> vector<16x256xbf16>
    %c0_8 = arith.constant 0 : index
    %c0_9 = arith.constant 0 : index
    %12 = vector.load %arg4[%c0_8, %c0_9] : memref<256x32xbf16, #tpu.memory_space<vmem>>, vector<256x32xbf16>
    %cst_10 = arith.constant dense<0.000000e+00> : vector<16x32xf32>
    %13 = tpu.matmul %11, %12, %cst_10 {dimension_numbers = #tpu.dot_dimension_numbers<[1], [0], [0], [1], [0, 0, 1, 1], [], []>} : vector<16x256xbf16>, vector<256x32xbf16>, vector<16x32xf32> -> vector<16x32xf32>
    %14 = vector.extract_strided_slice %13 {offsets = [0, 0], sizes = [8, 32], strides = [1, 1]} : vector<16x32xf32> to vector<8x32xf32>
    %15 = vector.extract_strided_slice %13 {offsets = [8, 0], sizes = [8, 32], strides = [1, 1]} : vector<16x32xf32> to vector<8x32xf32>
    %16 = arith.mulf %14, %14 : vector<8x32xf32>
    %17 = arith.subf %16, %15 : vector<8x32xf32>
    %cst_11 = arith.constant 5.000000e-01 : f32
    %18 = vector.broadcast %cst_11 : f32 to vector<8x32xf32>
    %19 = arith.mulf %18, %17 : vector<8x32xf32>
    %20 = arith.truncf %19 : vector<8x32xf32> to vector<8x32xbf16>
    %c0_12 = arith.constant 0 : index
    %c0_13 = arith.constant 0 : index
    %21 = vector.load %arg5[%c0_12, %c0_13] : memref<32x32xbf16, #tpu.memory_space<vmem>>, vector<32x32xbf16>
    %cst_14 = arith.constant dense<0.000000e+00> : vector<8x32xf32>
    %22 = tpu.matmul %20, %21, %cst_14 {dimension_numbers = #tpu.dot_dimension_numbers<[1], [0], [0], [1], [0, 0, 1, 1], [], []>} : vector<8x32xbf16>, vector<32x32xbf16>, vector<8x32xf32> -> vector<8x32xf32>
    %c0_15 = arith.constant 0 : index
    %c0_16 = arith.constant 0 : index
    %23 = vector.load %arg6[%c0_15, %c0_16] : memref<1x32xf32, #tpu.memory_space<vmem>>, vector<1x32xf32>
    %24 = vector.broadcast %23 : vector<1x32xf32> to vector<8x32xf32>
    %25 = arith.addf %22, %24 : vector<8x32xf32>
    %cst_17 = arith.constant 0.000000e+00 : f32
    %26 = vector.broadcast %cst_17 : f32 to vector<8x32xf32>
    %27 = arith.maximumf %25, %26 : vector<8x32xf32>
    %c0_18 = arith.constant 0 : index
    %c0_19 = arith.constant 0 : index
    %28 = vector.load %arg7[%c0_18, %c0_19] : memref<1x32xf32, #tpu.memory_space<vmem>>, vector<1x32xf32>
    %29 = vector.broadcast %28 : vector<1x32xf32> to vector<8x32xf32>
    %30 = arith.mulf %27, %29 : vector<8x32xf32>
    %cst_20 = arith.constant dense<0.000000e+00> : vector<8xf32>
    %31 = vector.multi_reduction <add>, %30, %cst_20 [1] : vector<8x32xf32> to vector<8xf32>
    %32 = vector.shape_cast %31 : vector<8xf32> to vector<8x1xf32>
    %33 = arith.mulf %4, %2 : vector<8x8xf32>
    %cst_21 = arith.constant dense<0.000000e+00> : vector<8xf32>
    %34 = vector.multi_reduction <add>, %33, %cst_21 [1] : vector<8x8xf32> to vector<8xf32>
    %35 = vector.shape_cast %34 : vector<8xf32> to vector<8x1xf32>
    %36 = arith.addf %32, %35 : vector<8x1xf32>
    %c0_22 = arith.constant 0 : index
    %37 = memref.load %arg8[%c0_22] : memref<1xf32, #tpu.memory_space<smem>>
    %38 = vector.broadcast %37 : f32 to vector<8x1xf32>
    %39 = arith.addf %36, %38 : vector<8x1xf32>
    %c0_23 = arith.constant 0 : index
    %c0_24 = arith.constant 0 : index
    %40 = vector.load %arg9[%c0_23, %c0_24] : memref<8x1xf32, #tpu.memory_space<vmem>>, vector<8x1xf32>
    tpu.vector_store %arg9[%c0_23, %c0_24], %39 {strides = array<i32>} : memref<8x1xf32, #tpu.memory_space<vmem>>, vector<8x1xf32>,
    return
  }
  func.func @transform_0(%arg0: i32) -> (i32, i32) {
    %c0_i32 = arith.constant 0 : i32
    %c0_i32_0 = arith.constant 0 : i32
    return %arg0, %c0_i32 : i32, i32
  }
  func.func @transform_1(%arg0: i32) -> (i32, i32, i32) {
    %c0_i32 = arith.constant 0 : i32
    %c0_i32_0 = arith.constant 0 : i32
    %c0_i32_1 = arith.constant 0 : i32
    return %c0_i32, %arg0, %c0_i32_0 : i32, i32, i32
  }
  func.func @transform_2(%arg0: i32) -> (i32, i32) {
    %c0_i32 = arith.constant 0 : i32
    %c0_i32_0 = arith.constant 0 : i32
    %c0_i32_1 = arith.constant 0 : i32
    return %c0_i32, %c0_i32_0 : i32, i32
  }
  func.func @transform_3(%arg0: i32) -> (i32, i32) {
    %c0_i32 = arith.constant 0 : i32
    %c0_i32_0 = arith.constant 0 : i32
    %c0_i32_1 = arith.constant 0 : i32
    return %c0_i32, %c0_i32_0 : i32, i32
  }
  func.func @transform_4(%arg0: i32) -> (i32, i32) {
    %c0_i32 = arith.constant 0 : i32
    %c0_i32_0 = arith.constant 0 : i32
    %c0_i32_1 = arith.constant 0 : i32
    return %c0_i32, %c0_i32_0 : i32, i32
  }
  func.func @transform_5(%arg0: i32) -> (i32, i32) {
    %c0_i32 = arith.constant 0 : i32
    %c0_i32_0 = arith.constant 0 : i32
    %c0_i32_1 = arith.constant 0 : i32
    return %c0_i32, %c0_i32_0 : i32, i32
  }
  func.func @transform_6(%arg0: i32) -> (i32, i32) {
    %c0_i32 = arith.constant 0 : i32
    %c0_i32_0 = arith.constant 0 : i32
    %c0_i32_1 = arith.constant 0 : i32
    return %c0_i32, %c0_i32_0 : i32, i32
  }
  func.func @transform_7(%arg0: i32) -> i32 {
    %c0_i32 = arith.constant 0 : i32
    %c0_i32_0 = arith.constant 0 : i32
    return %c0_i32 : i32
  }
  func.func @transform_8(%arg0: i32) -> (i32, i32) {
    %c0_i32 = arith.constant 0 : i32
    %c0_i32_0 = arith.constant 0 : i32
    return %arg0, %c0_i32 : i32, i32
  }
}

</mosaic_0001>

<bundles_post_ra>
// kernel: nfm_forward.1
= control target key start
LH: loop header
LB: loop body
LE: loop exit
PB: predicated region body
PF: predicated region fallthrough
CT: control target
= control target key end

     0   :  { %vm46_vm0 = vcmask 1043456   ;;  %v476_v1 = vmov 0   ;;  %vm42_vm1 = vcmask 64512   ;;  %v477_v38 = vmov 0.0   ;;  %s615_s2 = inlined_call_operand.vmem [shape: bf16[8,256], index: 2, kind: input, shape index: {}]   ;;  %s616_s1 = inlined_call_operand.vmem [shape: f32[2,8,8], index: 1, kind: input, shape index: {}]   ;;  %s617_s3 = inlined_call_operand.vmem [shape: bf16[256,32], index: 3, kind: input, shape index: {}]   ;;  %s618_s0 = inlined_call_operand.vmem [shape: bf16[8,256], index: 0, kind: input, shape index: {}]   ;;  %s619_s4 = inlined_call_operand.vmem [shape: bf16[32,32], index: 4, kind: input, shape index: {}]   ;;  %s620_s5 = inlined_call_operand.vmem [shape: f32[1,32], index: 5, kind: input, shape index: {}]   ;;  %s621_s6 = inlined_call_operand.vmem [shape: f32[1,32], index: 6, kind: input, shape index: {}]   ;;  %s622_s7 = inlined_call_operand.<no memory space> [shape: f32[1], index: 7, kind: input, shape index: {}]   ;;  %s623_s8 = inlined_call_operand.vmem [shape: f32[8,1], index: 8, kind: output, shape index: {}]  }
   0x1   :  { %v36_v0 = vld [vmem:[%s615_s2] sm:$0xff]  ;;  %85 = vmatprep.mubr.bf16.mxu0 %v476_v1  ;;  %v458_v5 = vld [vmem:[%s617_s3 + $0x78] sm:$0xff]   ;;  %v460_v9 = vld [vmem:[%s617_s3 + $0x70] sm:$0xff]   ;;  %vm478_vm2 = vmmov 0   ;;  %vm318_vm3 = vcmask 261120   ;;  %vm382_vm4 = vcmask 7168  }
   0x2   :  { %v530_v2 = vld [vmem:[%s616_s1] sm:$0xff]  ;;  %v390_v3 = vcombine.high %v36_v0, %v36_v0  ;;  %v389_v4 = vcombine.low %v36_v0, %v36_v0  ;;  %v459_v6 = vld [vmem:[%s617_s3 + $0x38] sm:$0xff]   ;;  %420 = vmatprep.subr.bf16.mxu1 %v458_v5  ;;  %v461_v10 = vld [vmem:[%s617_s3 + $0x30] sm:$0xff]   ;;  %v380_v0 = vstv %s622_s7 }
   0x3   :  { %v35_v8 = vpack.c.bf16 %v530_v2, %v530_v2  ;;  %421 = vmatpush3.bf16.msra.mxu1 %v459_v6  ;;  %v462_v11 = vld [vmem:[%s617_s3 + $0x68] sm:$0xff]   ;;  %v464_v13 = vld [vmem:[%s617_s3 + $0x60] sm:$0xff]   ;;  %v466_v15 = vld [vmem:[%s617_s3 + $0x58] sm:$0xff]  }
   0x4   :  { %391 = vmatprep.subr.msk.bf16.mxu0 %vm46_vm0, %v390_v3  ;;  %v48_v7 = vsel %vm46_vm0, %v389_v4, 0  ;;  %422 = vmatprep.subr.bf16.mxu1 %v460_v9  ;;  %v463_v12 = vld [vmem:[%s617_s3 + $0x28] sm:$0xff]   ;;  %v465_v14 = vld [vmem:[%s617_s3 + $0x20] sm:$0xff]   ;;  %v467_v16 = vld [vmem:[%s617_s3 + $0x18] sm:$0xff]  }
   0x5   :  { %68 = vmatpush1.bf16.msra.mxu0 %v48_v7  ;;  %v468_v17 = vld [vmem:[%s617_s3 + $0x50] sm:$0xff]   ;;  %v470_v19 = vld [vmem:[%s617_s3 + $0x48] sm:$0xff]   ;;  %v472_v21 = vld [vmem:[%s617_s3 + $0x40] sm:$0xff]  }
   0x6   :  { %v469_v18 = vld [vmem:[%s617_s3 + $0x10] sm:$0xff]   ;;  %v471_v20 = vld [vmem:[%s617_s3 + $0x8] sm:$0xff]   ;;  %v473_v22 = vld [vmem:[%s617_s3] sm:$0xff]   ;;  %445 = vmatprep.subr.bf16.mxu0 %v477_v38 }
   0x7   :  { %423 = vmatpush3.bf16.msra.mxu1 %v461_v10  ;;  %v31_v24 = vld [vmem:[%s618_s0] sm:$0xff]  ;;  %v474_v37 = vld [vmem:[%s619_s4 + $0x8] sm:$0xff]  }
   0x8   :  { %392 = vmatmul.mubr.msk.bf16.vlgmr.msra.gmra.mxu0 %vm42_vm1, %v35_v8  ;;  %424 = vmatprep.subr.bf16.mxu1 %v462_v11  ;;  %v475_v39 = vld [vmem:[%s619_s4] sm:$0xff]   ;;  %v388_v55 = vld [vmem:[%s616_s1 + $0x8] sm:$0xff] }
   0x9   :  { %446 = vmatpush3.bf16.msra.mxu0 %v474_v37  ;;  %449 = vmatprep.mubr.msk.bf16.mxu0 %vm478_vm2, %v477_v38  ;;  %v414_v50 = vld [vmem:[%s620_s5] ss:$0 sm:$0xff]  ;;  %v374_v59 = vmul.f32 %v388_v55, %v530_v2 }
   0xa   :  { %447 = vmatprep.subr.bf16.mxu0 %v477_v38  ;;  %v418_v54 = vld [vmem:[%s621_s6] ss:$0 sm:$0xff] }
   0xb   :  { %425 = vmatpush3.bf16.msra.mxu1 %v463_v12  ;;  %v375_v62 = vsel %vm42_vm1, %v374_v59, 0.0 }
   0xc   :  { %426 = vmatprep.subr.bf16.mxu1 %v464_v13 }
   0xd   :  { %448 = vmatpush3.bf16.msra.mxu0 %v475_v39 }
   0xf   :  { %427 = vmatpush3.bf16.msra.mxu1 %v465_v14 }
  0x10   :  { %428 = vmatprep.subr.bf16.mxu1 %v466_v15 }
  0x13   :  { %429 = vmatpush3.bf16.msra.mxu1 %v467_v16 }
  0x14   :  { %430 = vmatprep.subr.bf16.mxu1 %v468_v17 }
  0x17   :  { %431 = vmatpush3.bf16.msra.mxu1 %v469_v18 }
  0x18   :  { %432 = vmatprep.subr.bf16.mxu1 %v470_v19 }
  0x1b   :  { %433 = vmatpush3.bf16.msra.mxu1 %v471_v20 }
  0x1c   :  { %434 = vmatprep.subr.bf16.mxu1 %v472_v21 }
  0x1f   :  { %435 = vmatpush3.bf16.msra.mxu1 %v473_v22 }
  0xc8   :  { %v87_v23 = vpop.f32.mrf.mxu0 }
  0xca   :  { %v89_v25 = vpop.f32.mrf.mxu0 }
  0xcb   :  { %v419_v26 = vpack.c.bf16 %v89_v25, %v87_v23 }
  0xcc   :  { %v91_v27 = vpop.f32.mrf.mxu0 }
  0xcd   :  { %v102_v28 = vmul.bf16 %v419_v26, %v31_v24 }
  0xce   :  { %v92_v29 = vpop.f32.mrf.mxu0 }
  0xcf   :  { %v103_v30 = vmul.bf16 %v102_v28, %v102_v28  ;;  %v395_v31 = vcombine.high %v102_v28, %v102_v28  ;;  %v394_v33 = vcombine.low %v102_v28, %v102_v28 }
  0xd1   :  { %v397_v32 = vcombine.high %v103_v30, %v103_v30  ;;  %v396_v34 = vcombine.low %v103_v30, %v103_v30 }
  0xd3   :  { %v120_v35 = vsel %vm46_vm0, %v395_v31, %v397_v32  ;;  %v116_v36 = vsel %vm46_vm0, %v394_v33, %v396_v34 }
  0xd4   :  { %282 = vmatprep.mubr.bf16.mxu1 %v120_v35 }
  0xd5   :  { %283 = vmatmul.mubr.bf16.vlgmr.msra.gmra.mxu1 %v116_v36 }
 0x195   :  { %v436_v40 = vpop.f32.mrf.mxu1 }
 0x197   :  { %v437_v41 = vpop.f32.mrf.mxu1 }
 0x198   :  { %v438_v42 = vadd.f32 %v437_v41, %v436_v40 }
 0x199   :  { %v439_v43 = vpop.f32.mrf.mxu1 }
 0x19a   :  { %v291_v45 = vmul.f32 %v438_v42, %v438_v42 }
 0x19b   :  { %v440_v44 = vpop.f32.mrf.mxu1 }
 0x19c   :  { %v441_v46 = vadd.f32 %v440_v44, %v439_v43 }
 0x19e   :  { %v292_v47 = vsub.f32 %v291_v45, %v441_v46 }
 0x1a0   :  { %v293_v48 = vmul.f32 0.5, %v292_v47 }
 0x1a2   :  { %v294_v49 = vpack.c.bf16 %v293_v48, %v293_v48 }
 0x1a4   :  { %450 = vmatmul.mubr.msk.bf16.vlgmr.msra.gmra.mxu0 %vm318_vm3, %v294_v49 }
 0x264   :  { %v356_v51 = vpop.f32.mrf.mxu0 }
 0x265   :  { %v357_v52 = vadd.f32 %v414_v50, %v356_v51 }
 0x266   :  { %v451_v53 = vpop.f32.mrf.mxu0 }
 0x267   :  { %v362_v56 = vmax.f32 %v357_v52, 0.0 }
 0x268   :  { %v359_v57 = vpop.f32.mrf.mxu0 }
 0x269   :  { %v370_v58 = vmul.f32 %v418_v54, %v362_v56 }
 0x26a   :  { %v452_v60 = vpop.f32.mrf.mxu0 }
 0x26b   :  { %v371_v61 = vsel %vm318_vm3, %v370_v58, 0.0 }
 0x26c   :  { %372 = vadd.xlane.f32.xlu0 %v371_v61 }
 0x270   :  { %376 = vadd.xlane.f32.xlu0 %v375_v62 }
 0x2f5   :  { %v373_v63 = vpop.xlane.xlu0 %372 }
 0x2f9   :  { %v377_v1 = vpop.xlane.xlu0 %376 }
 0x2fa   :  { %v378_v3 = vadd.f32 %v377_v1, %v373_v63 }
 0x2fc   :  { %v381_v4 = vadd.f32 %v380_v0, %v378_v3 }
 0x2fe   :  { %383 = vst.msk [vmem:[%s623_s8] sm:$0xff] %vm382_vm4, %v381_v4 }

</bundles_post_ra>
